<compile_context>
chip_gen: v7x
topology: tpu7x:2x2x1
jax: 0.10.0
libtpu: 0.0.40
codegen_flags: <defaults>
</compile_context>

<pallas_src>
import jax
import jax.numpy as jnp
from jax.experimental import pallas as pl
from jax.experimental.pallas import tpu as pltpu

HIDDEN = 768
EPS = 1e-6


def _round_up(n, m):
    return ((n + m - 1) // m) * m


def layernorm_kernel(x_ref, res_ref, gamma_ref, beta_ref, o_ref):
    x = x_ref[...].astype(jnp.float32)          # (tile, H)
    res = res_ref[...].astype(jnp.float32)      # (tile, H)
    gamma = gamma_ref[...].astype(jnp.float32)  # (1, H)
    beta = beta_ref[...].astype(jnp.float32)    # (1, H)

    h = jnp.float32(HIDDEN)
    # Single-pass moments: the two cross-lane reductions are independent, so
    # they can overlap on the XLUs instead of serializing mean -> diff^2 -> sum.
    row_sum = jnp.sum(x, axis=-1, keepdims=True)        # (tile, 1)
    row_sumsq = jnp.sum(x * x, axis=-1, keepdims=True)  # (tile, 1)
    mean = row_sum * (1.0 / h)
    # torch.std default is unbiased (Bessel's correction: divide by H-1).
    var = (row_sumsq - row_sum * mean) / (h - 1.0)
    var = jnp.maximum(var, 0.0)                 # guard tiny negative fp error
    std = jnp.sqrt(var)

    # Per-row reciprocal on the (tile, 1) column, then a plain multiply over the
    # full tile instead of a full-tile divide.  approx=False keeps the 1e-4
    # tolerance comfortably and is still much cheaper than the broadcast divide.
    inv = pl.reciprocal(std + EPS, approx=False)  # (tile, 1)

    diff = x - mean
    # gamma/beta are each broadcast exactly once; residual folded into the
    # same elementwise pass.
    y = diff * inv * gamma + (beta + res)
    o_ref[...] = y.astype(o_ref.dtype)


def layer_normalization(x, residual, gamma, beta, *, tile_rows=1024):
    """x, residual: (..., 768). gamma, beta: (768,). Output dtype follows x."""
    orig_shape = x.shape
    H = orig_shape[-1]
    assert H == HIDDEN
    x2 = x.reshape(-1, H)
    r2 = residual.reshape(-1, H)
    R = x2.shape[0]

    # Choose the row tile: no larger than the (padded) row count, multiple of 8
    # (sublane granularity).  Rows are padded up to a multiple of the tile so
    # tile_rows is a pure performance knob.
    tile = int(min(tile_rows, _round_up(max(R, 8), 8)))
    tile = max(8, (tile // 8) * 8)
    R_pad = _round_up(R, tile)
    if R_pad != R:
        pad = R_pad - R
        x2 = jnp.pad(x2, ((0, pad), (0, 0)))
        r2 = jnp.pad(r2, ((0, pad), (0, 0)))

    gamma2 = gamma.reshape(1, H)
    beta2 = beta.reshape(1, H)

    # VMEM budget: 3 streams (x, residual, out) double-buffered + params.
    # Explicit limit so v5e's 16 MiB scoped default doesn't block large tiles,
    # while staying well under v7x's 64 MiB physical VMEM at the default tile.
    itemsize = jnp.dtype(x.dtype).itemsize
    vmem_needed = 6 * tile * H * itemsize + 4 * H * 4
    vmem_limit = int(min(100 * 1024 * 1024,
                         max(32 * 1024 * 1024, int(vmem_needed * 1.5))))

    out = pl.pallas_call(
        layernorm_kernel,
        out_shape=jax.ShapeDtypeStruct((R_pad, H), x.dtype),
        grid_spec=pltpu.PrefetchScalarGridSpec(
            num_scalar_prefetch=0,
            grid=(R_pad // tile,),
            in_specs=[
                pl.BlockSpec((tile, H), lambda i: (i, 0)),
                pl.BlockSpec((tile, H), lambda i: (i, 0)),
                pl.BlockSpec((1, H), lambda i: (0, 0)),
                pl.BlockSpec((1, H), lambda i: (0, 0)),
            ],
            out_specs=pl.BlockSpec((tile, H), lambda i: (i, 0)),
        ),
        compiler_params=pltpu.CompilerParams(
            # 1-D grid over row tiles; "parallel" lets megacore (v7x: 2 TCs)
            # shard the grid when R_pad // tile >= 2.
            dimension_semantics=("parallel",),
            vmem_limit_bytes=vmem_limit,
        ),
    )(x2, r2, gamma2, beta2)

    if R_pad != R:
        out = out[:R]
    return out.reshape(orig_shape)


if __name__ == "__main__":
    key = jax.random.PRNGKey(0)
    k1, k2 = jax.random.split(key)

    batch, seq = 2, 8
    x = jax.random.normal(k1, (batch, seq, HIDDEN), dtype=jnp.float32)
    residual = jax.random.normal(k2, (batch, seq, HIDDEN), dtype=jnp.float32)

    # Deterministic parameter init matching nn.Parameter(torch.ones/zeros(768)).
    gamma = jnp.ones((HIDDEN,), dtype=jnp.float32)
    beta = jnp.zeros((HIDDEN,), dtype=jnp.float32)

    out = layer_normalization(x, residual, gamma, beta)
    out = jax.block_until_ready(out)

    # Reference in plain JAX (unbiased std + eps added to std, matching torch.std
    # semantics of the original module).
    mean = jnp.mean(x, axis=-1, keepdims=True)
    std = jnp.std(x, axis=-1, keepdims=True, ddof=1)
    ref = gamma * (x - mean) / (std + 1e-6) + beta + residual
    assert jnp.allclose(out, ref, atol=1e-4, rtol=1e-4)

    print("KERNEL_OK")
</pallas_src>

<mosaic_0001>
module attributes {stable_mosaic.version = 11 : i64} {
  func.func @layernorm_kernel(%arg0: i32, %arg1: memref<16x768xf32, #tpu.memory_space<vmem>>, %arg2: memref<16x768xf32, #tpu.memory_space<vmem>>, %arg3: memref<1x768xf32, #tpu.memory_space<vmem>>, %arg4: memref<1x768xf32, #tpu.memory_space<vmem>>, %arg5: memref<16x768xf32, #tpu.memory_space<vmem>>) attributes {dimension_semantics = [#tpu.dimension_semantics<parallel>], iteration_bounds = array<i64: 1>, scalar_prefetch = 0 : i64, scratch_operands = 0 : i64, tpu.core_type = #tpu.core_type<tc>, window_params = [{transform_indices = @transform_0, window_bounds = array<i64: 16, 768>}, {transform_indices = @transform_1, window_bounds = array<i64: 16, 768>}, {pipeline_mode = #tpu.pipeline_mode<synchronous>, transform_indices = @transform_2, window_bounds = array<i64: 1, 768>}, {pipeline_mode = #tpu.pipeline_mode<synchronous>, transform_indices = @transform_3, window_bounds = array<i64: 1, 768>}, {transform_indices = @transform_4, window_bounds = array<i64: 16, 768>}]} {
    %c0 = arith.constant 0 : index
    %c0_0 = arith.constant 0 : index
    %0 = vector.load %arg1[%c0, %c0_0] : memref<16x768xf32, #tpu.memory_space<vmem>>, vector<16x768xf32>
    %c0_1 = arith.constant 0 : index
    %c0_2 = arith.constant 0 : index
    %1 = vector.load %arg2[%c0_1, %c0_2] : memref<16x768xf32, #tpu.memory_space<vmem>>, vector<16x768xf32>
    %c0_3 = arith.constant 0 : index
    %c0_4 = arith.constant 0 : index
    %2 = vector.load %arg3[%c0_3, %c0_4] : memref<1x768xf32, #tpu.memory_space<vmem>>, vector<1x768xf32>
    %c0_5 = arith.constant 0 : index
    %c0_6 = arith.constant 0 : index
    %3 = vector.load %arg4[%c0_5, %c0_6] : memref<1x768xf32, #tpu.memory_space<vmem>>, vector<1x768xf32>
    %cst = arith.constant dense<0.000000e+00> : vector<16xf32>
    %4 = vector.multi_reduction <add>, %0, %cst [1] : vector<16x768xf32> to vector<16xf32>
    %5 = vector.shape_cast %4 : vector<16xf32> to vector<16x1xf32>
    %6 = arith.mulf %0, %0 : vector<16x768xf32>
    %cst_7 = arith.constant dense<0.000000e+00> : vector<16xf32>
    %7 = vector.multi_reduction <add>, %6, %cst_7 [1] : vector<16x768xf32> to vector<16xf32>
    %8 = vector.shape_cast %7 : vector<16xf32> to vector<16x1xf32>
    %cst_8 = arith.constant 1.000000e+00 : f32
    %cst_9 = arith.constant 7.680000e+02 : f32
    %9 = arith.divf %cst_8, %cst_9 : f32
    %10 = vector.broadcast %9 : f32 to vector<16x1xf32>
    %11 = arith.mulf %5, %10 : vector<16x1xf32>
    %12 = arith.mulf %5, %11 : vector<16x1xf32>
    %13 = arith.subf %8, %12 : vector<16x1xf32>
    %cst_10 = arith.constant 7.680000e+02 : f32
    %cst_11 = arith.constant 1.000000e+00 : f32
    %14 = arith.subf %cst_10, %cst_11 : f32
    %15 = vector.broadcast %14 : f32 to vector<16x1xf32>
    %16 = arith.divf %13, %15 : vector<16x1xf32>
    %cst_12 = arith.constant 0.000000e+00 : f32
    %17 = vector.broadcast %cst_12 : f32 to vector<16x1xf32>
    %18 = arith.maximumf %16, %17 : vector<16x1xf32>
    %19 = math.sqrt %18 : vector<16x1xf32>
    %cst_13 = arith.constant 9.99999997E-7 : f32
    %20 = vector.broadcast %cst_13 : f32 to vector<16x1xf32>
    %21 = arith.addf %19, %20 : vector<16x1xf32>
    %22 = tpu.reciprocal %21 : vector<16x1xf32> -> vector<16x1xf32>
    %23 = vector.broadcast %11 : vector<16x1xf32> to vector<16x768xf32>
    %24 = arith.subf %0, %23 : vector<16x768xf32>
    %25 = vector.broadcast %22 : vector<16x1xf32> to vector<16x768xf32>
    %26 = arith.mulf %24, %25 : vector<16x768xf32>
    %27 = vector.broadcast %2 : vector<1x768xf32> to vector<16x768xf32>
    %28 = arith.mulf %26, %27 : vector<16x768xf32>
    %29 = vector.broadcast %3 : vector<1x768xf32> to vector<16x768xf32>
    %30 = arith.addf %29, %1 : vector<16x768xf32>
    %31 = arith.addf %28, %30 : vector<16x768xf32>
    %c0_14 = arith.constant 0 : index
    %c0_15 = arith.constant 0 : index
    %32 = vector.load %arg5[%c0_14, %c0_15] : memref<16x768xf32, #tpu.memory_space<vmem>>, vector<16x768xf32>
    tpu.vector_store %arg5[%c0_14, %c0_15], %31 {strides = array<i32>} : memref<16x768xf32, #tpu.memory_space<vmem>>, vector<16x768xf32>,
    return
  }
  func.func @transform_0(%arg0: i32) -> (i32, i32) {
    %c0_i32 = arith.constant 0 : i32
    %c0_i32_0 = arith.constant 0 : i32
    return %arg0, %c0_i32 : i32, i32
  }
  func.func @transform_1(%arg0: i32) -> (i32, i32) {
    %c0_i32 = arith.constant 0 : i32
    %c0_i32_0 = arith.constant 0 : i32
    return %arg0, %c0_i32 : i32, i32
  }
  func.func @transform_2(%arg0: i32) -> (i32, i32) {
    %c0_i32 = arith.constant 0 : i32
    %c0_i32_0 = arith.constant 0 : i32
    %c0_i32_1 = arith.constant 0 : i32
    return %c0_i32, %c0_i32_0 : i32, i32
  }
  func.func @transform_3(%arg0: i32) -> (i32, i32) {
    %c0_i32 = arith.constant 0 : i32
    %c0_i32_0 = arith.constant 0 : i32
    %c0_i32_1 = arith.constant 0 : i32
    return %c0_i32, %c0_i32_0 : i32, i32
  }
  func.func @transform_4(%arg0: i32) -> (i32, i32) {
    %c0_i32 = arith.constant 0 : i32
    %c0_i32_0 = arith.constant 0 : i32
    return %arg0, %c0_i32 : i32, i32
  }
}

</mosaic_0001>

<bundles_post_ra>
// kernel: tpu_custom_call.1
= control target key start
LH: loop header
LB: loop body
LE: loop exit
PB: predicated region body
PF: predicated region fallthrough
CT: control target
= control target key end

     0   :  { %9 = vsyncpa [#allocation3], 0  ;;  %s612_s0 = inlined_call_operand.hbm [shape: f32[16,768], index: 0, kind: input, shape index: {}]   ;;  %s613_s1 = inlined_call_operand.hbm [shape: f32[16,768], index: 1, kind: input, shape index: {}]   ;;  %s614_s2 = inlined_call_operand.vmem [shape: f32[1,768], index: 2, kind: input, shape index: {}]   ;;  %s615_s3 = inlined_call_operand.hbm [shape: f32[1,768], index: 3, kind: input, shape index: {}]   ;;  %s616_s4 = inlined_call_operand.hbm [shape: f32[16,768], index: 4, kind: output, shape index: {}]  }
   0x1   :  { %10 = vsyncpa [#allocation6], 0 }
   0x2   :  { %11 = vsyncpa [#allocation4], 0  ;;  %s412_s15 = smov [#allocation5]   ;;  %s413_s17 = smov [#allocation2]  }
   0x3   :  { %s29_s16 = sshll.u32 %s412_s15, 4  ;;  %s17_s18 = sshll.u32 %s413_s17, 4  ;;  %s30_s16 = int_to_ptr.vmem [resolvable:$true] %s29_s16  ;;  %s443_s18 = int_to_ptr.vmem [resolvable:$true] %s17_s18 }
   0x4   :  { %s318_s21 = scalar_lea.hbm %s613_s1, 1536 }
   0x5   :  { %p319_p0 = scmp.ne.s32.totalorder %s613_s1, %s318_s21  ;;  %p322_p1 = scmp.lt.u32.totalorder %s318_s21, %s613_s1 }
   0x7   :  { %p324_p2 = pnand %p322_p1, %p319_p0 }
   0x9   :  { %327 = shalt.err (!%p324_p2)
}
   0xa   :  { %s328_s26 = scalar_lea.vmem %s30_s16, 1536  ;;  %p333_p4 = scmp.lt.s32.totalorder %s30_s16, %s30_s16 }
   0xb   :  { %p329_p3 = scmp.ne.s32.totalorder %s30_s16, %s328_s26  ;;  %p334_p5 = scmp.lt.s32.totalorder %s328_s26, %s328_s26 }
   0xd   :  { %p335_p6 = por %p334_p5, %p333_p4 }
   0xf   :  { %p336_p7 = pnand %p335_p6, %p329_p3 }
  0x11   :  { %339 = shalt.err (!%p336_p7)
}
  0x12   :  { %s414_s27 = smov 768   ;;  %s415_s28 = smov 48  }
  0x13   :  { %35 = dma.hbm_to_vmem [thread:$0]  %s613_s1, 1536, %s30_s16, [#allocation6], %s414_s27, %s414_s27, %s415_s28  }
  0x14   :  { %s340_s7 = scalar_lea.hbm %s612_s0, 1536 }
  0x15   :  { %p341_p8 = scmp.ne.s32.totalorder %s612_s0, %s340_s7  ;;  %p344_p9 = scmp.lt.u32.totalorder %s340_s7, %s612_s0 }
  0x17   :  { %p346_p10 = pnand %p344_p9, %p341_p8 }
  0x19   :  { %349 = shalt.err (!%p346_p10)
}
  0x1a   :  { %s350_s12 = scalar_lea.vmem %s443_s18, 1536  ;;  %p355_p12 = scmp.lt.s32.totalorder %s443_s18, %s443_s18 }
  0x1b   :  { %p351_p11 = scmp.ne.s32.totalorder %s443_s18, %s350_s12  ;;  %p356_p13 = scmp.lt.s32.totalorder %s350_s12, %s350_s12 }
  0x1d   :  { %p357_p0 = por %p356_p13, %p355_p12 }
  0x1f   :  { %p358_p1 = pnand %p357_p0, %p351_p11 }
  0x21   :  { %361 = shalt.err (!%p358_p1)
}
  0x22   :  { %23 = dma.hbm_to_vmem [thread:$0]  %s612_s0, 1536, %s443_s18, [#allocation3], %s414_s27, %s414_s27, %s415_s28  }
  0x23   :  { %s416_s14 = smov [#allocation7]   ;;  %s362_s19 = scalar_lea.hbm %s615_s3, 96 }
  0x24   :  { %s44_s15 = sshll.u32 %s416_s14, 4  ;;  %p363_p2 = scmp.ne.s32.totalorder %s615_s3, %s362_s19  ;;  %s45_s15 = int_to_ptr.vmem [resolvable:$true] %s44_s15 }
  0x25   :  { %p366_p3 = scmp.lt.u32.totalorder %s362_s19, %s615_s3 }
  0x27   :  { %p368_p4 = pnand %p366_p3, %p363_p2 }
  0x29   :  { %371 = shalt.err (!%p368_p4)
}
  0x2a   :  { %s372_s24 = scalar_lea.vmem %s45_s15, 96  ;;  %p377_p6 = scmp.lt.s32.totalorder %s45_s15, %s45_s15 }
  0x2b   :  { %p373_p5 = scmp.ne.s32.totalorder %s45_s15, %s372_s24  ;;  %p378_p7 = scmp.lt.s32.totalorder %s372_s24, %s372_s24 }
  0x2d   :  { %p379_p8 = por %p378_p7, %p377_p6 }
  0x2f   :  { %p380_p9 = pnand %p379_p8, %p373_p5 }
  0x31   :  { %383 = shalt.err (!%p380_p9)
}
  0x32   :  { %47 = dma.hbm_to_vmem [thread:$0]  %s615_s3, 96, %s45_s15, [#allocation6]  }
  0x33   :  { %406 = dma.done.wait [#allocation3], 1536  }
  0x34   :  { %407 = vsyncadd [#allocation3], 4294965760 }
  0x35   :  { %408 = dma.done.wait [#allocation6], 1632  }
  0x36   :  { %409 = vsyncadd [#allocation6], 4294965664  ;;  %v492_v0 = vld [vmem:[#allocation2] sm:$0xff]  ;;  %v494_v1 = vld [vmem:[#allocation2 + $0x8] sm:$0xff]  ;;  %v177_v58 = vlaneseq }
  0x37   :  { %v496_v2 = vld [vmem:[#allocation2 + $0x10] sm:$0xff]  ;;  %v498_v3 = vld [vmem:[#allocation2 + $0x18] sm:$0xff]  ;;  %v83_v4 = vadd.f32 %v494_v1, %v492_v0  ;;  %v97_v5 = vmul.f32 %v492_v0, %v492_v0  ;;  %v98_v6 = vmul.f32 %v494_v1, %v494_v1  ;;  %v514_v11 = vld [vmem:[#allocation2 + $0x40] sm:$0xff] }
  0x38   :  { %v99_v7 = vmul.f32 %v496_v2, %v496_v2  ;;  %v100_v8 = vmul.f32 %v498_v3, %v498_v3  ;;  %v510_v9 = vld [vmem:[#allocation2 + $0x30] sm:$0xff]  ;;  %v512_v10 = vld [vmem:[#allocation2 + $0x38] sm:$0xff]  ;;  %v521_v16 = vld [vmem:[#allocation2 + $0x20] sm:$0xff]  ;;  %v105_v19 = vmul.f32 %v514_v11, %v514_v11  ;;  %v178_v60 = vshrl.u32 %v177_v58, 7 }
  0x39   :  { %v84_v12 = vadd.f32 %v83_v4, %v496_v2  ;;  %v109_v13 = vadd.f32 %v98_v6, %v97_v5  ;;  %v90_v14 = vadd.f32 %v512_v10, %v510_v9  ;;  %v103_v15 = vmul.f32 %v510_v9, %v510_v9  ;;  %v523_v17 = vld [vmem:[#allocation2 + $0x48] sm:$0xff]  ;;  %v535_v25 = vld [vmem:[#allocation2 + $0x50] sm:$0xff]  ;;  %v543_v32 = vld [vmem:[#allocation2 + $0x58] sm:$0xff] }
  0x3a   :  { %v104_v18 = vmul.f32 %v512_v10, %v512_v10  ;;  %v101_v21 = vmul.f32 %v521_v16, %v521_v16  ;;  %v533_v24 = vld [vmem:[#allocation2 + $0x28] sm:$0xff]  ;;  %v106_v26 = vmul.f32 %v523_v17, %v523_v17  ;;  %v107_v33 = vmul.f32 %v535_v25, %v535_v25  ;;  %v82_v5 = vld [vmem:[#allocation7] sm:$0x3f] }
  0x3b   :  { %v85_v20 = vadd.f32 %v84_v12, %v498_v3  ;;  %v110_v22 = vadd.f32 %v109_v13, %v99_v7  ;;  %v91_v23 = vadd.f32 %v90_v14, %v514_v11  ;;  %v102_v29 = vmul.f32 %v533_v24, %v533_v24 }
  0x3c   :  { %v116_v27 = vadd.f32 %v104_v18, %v103_v15  ;;  %v108_v38 = vmul.f32 %v543_v32, %v543_v32  ;;  %v179_v6 = vsub.s32 0, %v178_v60  ;;  %v183_v12 = vsub.s32 1, %v178_v60 }
  0x3d   :  { %v86_v28 = vadd.f32 %v85_v20, %v521_v16  ;;  %v111_v30 = vadd.f32 %v110_v22, %v100_v8  ;;  %v92_v31 = vadd.f32 %v91_v23, %v523_v17  ;;  %v187_v13 = vsub.s32 2, %v178_v60  ;;  %v81_v22 = vld [vmem:[%s614_s2] sm:$0x3f]  ;;  %s417_s2 = smov [#allocation8]  }
  0x3e   :  { %v117_v34 = vadd.f32 %v116_v27, %v105_v19  ;;  %v191_v14 = vsub.s32 3, %v178_v60  ;;  %v195_v18 = vsub.s32 4, %v178_v60  ;;  %v199_v19 = vsub.s32 5, %v178_v60  ;;  %v69_v27 = vld [vmem:[#allocation5] sm:$0xff]  ;;  %s291_s26 = sshll.u32 %s417_s2, 4  ;;  %s292_s26 = int_to_ptr.vmem [resolvable:$true] %s291_s26 }
  0x3f   :  { %v87_v35 = vadd.f32 %v86_v28, %v533_v24  ;;  %v112_v36 = vadd.f32 %v111_v30, %v101_v21  ;;  %v93_v37 = vadd.f32 %v92_v31, %v535_v25  ;;  %v223_v23 = vrot.slane %v82_v5, %v179_v6  ;;  %v70_v28 = vld [vmem:[#allocation5 + $0x8] sm:$0xff]  ;;  %s384_s29 = scalar_lea.vmem %s292_s26, 1536  ;;  %p389_p11 = scmp.lt.s32.totalorder %s292_s26, %s292_s26 }
  0x40   :  { %v118_v39 = vadd.f32 %v117_v34, %v106_v26  ;;  %v227_v30 = vrot.slane %v82_v5, %v183_v12  ;;  %v231_v31 = vrot.slane %v82_v5, %v187_v13  ;;  %p385_p10 = scmp.ne.s32.totalorder %s292_s26, %s384_s29  ;;  %p390_p12 = scmp.lt.s32.totalorder %s384_s29, %s384_s29 }
  0x41   :  { %88 = vadd.xlane.f32.xlu0 %v87_v35  ;;  %v113_v40 = vadd.f32 %v112_v36, %v102_v29  ;;  %v94_v41 = vadd.f32 %v93_v37, %v543_v32  ;;  %v71_v29 = vld [vmem:[#allocation5 + $0x10] sm:$0xff]  ;;  %v72_v35 = vld [vmem:[#allocation5 + $0x18] sm:$0xff]  ;;  %v73_v36 = vld [vmem:[#allocation5 + $0x20] sm:$0xff] }
  0x42   :  { %v119_v42 = vadd.f32 %v118_v39, %v107_v33  ;;  %v235_v33 = vrot.slane %v82_v5, %v191_v14  ;;  %v74_v37 = vld [vmem:[#allocation5 + $0x28] sm:$0xff]  ;;  %v243_v39 = vrot.slane %v82_v5, %v199_v19  ;;  %p391_p13 = por %p390_p12, %p389_p11 }
  0x43   :  { %114 = vadd.xlane.f32.xlu1 %v113_v40  ;;  %v75_v40 = vld [vmem:[#allocation5 + $0x30] sm:$0xff] }
  0x44   :  { %v120_v43 = vadd.f32 %v119_v42, %v108_v38  ;;  %v239_v38 = vrot.slane %v82_v5, %v195_v18  ;;  %v77_v42 = vld [vmem:[#allocation5 + $0x40] sm:$0xff]  ;;  %v256_v60 = vadd.f32 %v223_v23, %v75_v40  ;;  %p392_p0 = pnand %p391_p13, %p385_p10 }
  0x45   :  { %95 = vadd.xlane.f32.xlu0 %v94_v41  ;;  %v76_v41 = vld [vmem:[#allocation5 + $0x38] sm:$0xff] }
  0x46   :  { %v254_v58 = vadd.f32 %v239_v38, %v73_v36 }
  0x47   :  { %121 = vadd.xlane.f32.xlu1 %v120_v43  ;;  %v561_v43 = vrot.slane %v81_v22, %v179_v6 }
  0xce   :  { %v89_v44 = vpop.xlane.xlu0 %88 }
  0xcf   :  { %v552_v45 = vmul.f32 0.0013020834, %v89_v44 }
  0xd0   :  { %v115_v46 = vpop.xlane.xlu1 %114 }
  0xd1   :  { %v125_v47 = vmul.f32 %v552_v45, %v89_v44  ;;  %v563_v44 = vrot.slane %v81_v22, %v183_v12  ;;  %v152_v6 = vsub.f32 %v492_v0, %v552_v45  ;;  %v155_v12 = vsub.f32 %v498_v3, %v552_v45 }
  0xd2   :  { %v96_v48 = vpop.xlane.xlu0 %95 }
  0xd3   :  { %v127_v49 = vsub.f32 %v115_v46, %v125_v47  ;;  %v555_v50 = vmul.f32 0.0013020834, %v96_v48  ;;  %v565_v46 = vrot.slane %v81_v22, %v187_v13  ;;  %v78_v47 = vld [vmem:[#allocation5 + $0x48] sm:$0xff] }
  0xd4   :  { %v122_v51 = vpop.xlane.xlu1 %121 }
  0xd5   :  { %v130_v52 = vmul.f32 0.0013037809, %v127_v49  ;;  %v126_v53 = vmul.f32 %v555_v50, %v96_v48  ;;  %v79_v48 = vld [vmem:[#allocation5 + $0x50] sm:$0xff]  ;;  %v80_v49 = vld [vmem:[#allocation5 + $0x58] sm:$0xff]  ;;  %v159_v0 = vsub.f32 %v512_v10, %v555_v50  ;;  %v160_v3 = vsub.f32 %v514_v11, %v555_v50 }
  0xd6   :  { %v261_v5 = vadd.f32 %v243_v39, %v80_v49  ;;  %v162_v10 = vsub.f32 %v535_v25, %v555_v50 }
  0xd7   :  { %v132_v54 = vmax.f32 %v130_v52, 0.0  ;;  %v128_v55 = vsub.f32 %v122_v51, %v126_v53  ;;  %v192_v51 = vrot.slane %v81_v22, %v191_v14  ;;  %v196_v52 = vrot.slane %v81_v22, %v195_v18 }
  0xd8   :  { %v200_v53 = vrot.slane %v81_v22, %v199_v19  ;;  %v156_v14 = vsub.f32 %v521_v16, %v552_v45  ;;  %v158_v18 = vsub.f32 %v510_v9, %v555_v50 }
  0xd9   :  { %310 = vrsqrt.f32 %v132_v54  ;;  %v131_v56 = vmul.f32 0.0013037809, %v128_v55  ;;  %vm136_vm0 = vcmp.eq.f32.partialorder %v132_v54, inf  ;;  %v139_v62 = vand.u32 2147483648, %v132_v54 }
  0xda   :  { %vm138_vm1 = vcmp.eq.f32.partialorder %v132_v54, 0.0  ;;  %v251_v55 = vadd.f32 %v227_v30, %v70_v28 }
  0xdb   :  { %v133_v57 = vmax.f32 %v131_v56, 0.0  ;;  %v252_v56 = vadd.f32 %v231_v31, %v71_v29 }
  0xdd   :  { %312 = vrsqrt.f32 %v133_v57  ;;  %vm143_vm2 = vcmp.eq.f32.partialorder %v133_v57, inf  ;;  %v146_v20 = vand.u32 2147483648, %v133_v57  ;;  %vm145_vm3 = vcmp.eq.f32.partialorder %v133_v57, 0.0 }
  0xe3   :  { %v311_v59 = vpop.eup %310 }
  0xe4   :  { %v135_v61 = vmul.f32 %v311_v59, %v132_v54  ;;  %v255_v59 = vadd.f32 %v243_v39, %v74_v37 }
  0xe6   :  { %v137_v63 = vsel %vm136_vm0, %v132_v54, %v135_v61  ;;  %v250_v54 = vadd.f32 %v223_v23, %v69_v27  ;;  %v257_v61 = vadd.f32 %v227_v30, %v76_v41 }
  0xe7   :  { %v140_v4 = vsel %vm138_vm1, %v139_v62, %v137_v63  ;;  %v313_v7 = vpop.eup %312  ;;  %v258_v62 = vadd.f32 %v231_v31, %v77_v42  ;;  %v259_v63 = vadd.f32 %v235_v33, %v78_v47 }
  0xe8   :  { %v148_v8 = vadd.f32 1e-06, %v140_v4  ;;  %v142_v15 = vmul.f32 %v313_v7, %v133_v57  ;;  %v260_v4 = vadd.f32 %v239_v38, %v79_v48  ;;  %v153_v7 = vsub.f32 %v494_v1, %v552_v45 }
  0xea   :  { %314 = vrcp.f32 %v148_v8  ;;  %v144_v21 = vsel %vm143_vm2, %v133_v57, %v142_v15  ;;  %v253_v57 = vadd.f32 %v235_v33, %v72_v35  ;;  %v154_v8 = vsub.f32 %v496_v2, %v552_v45 }
  0xeb   :  { %v147_v26 = vsel %vm145_vm3, %v146_v20, %v144_v21  ;;  %v157_v15 = vsub.f32 %v533_v24, %v552_v45  ;;  %v161_v21 = vsub.f32 %v523_v17, %v555_v50 }
  0xec   :  { %v149_v34 = vadd.f32 1e-06, %v147_v26  ;;  %v163_v26 = vsub.f32 %v543_v32, %v555_v50 }
  0xee   :  { %316 = vrcp.f32 %v149_v34 }
  0xf4   :  { %v315_v13 = vpop.eup %314 }
  0xf5   :  { %v164_v1 = vmul.f32 %v315_v13, %v152_v6  ;;  %v165_v19 = vmul.f32 %v315_v13, %v153_v7  ;;  %v166_v20 = vmul.f32 %v315_v13, %v154_v8  ;;  %v167_v2 = vmul.f32 %v315_v13, %v155_v12 }
  0xf6   :  { %v168_v16 = vmul.f32 %v315_v13, %v156_v14  ;;  %v169_v22 = vmul.f32 %v315_v13, %v157_v15 }
  0xf7   :  { %v207_v24 = vmul.f32 %v561_v43, %v164_v1  ;;  %v208_v45 = vmul.f32 %v563_v44, %v165_v19  ;;  %v209_v9 = vmul.f32 %v565_v46, %v166_v20  ;;  %v210_v23 = vmul.f32 %v192_v51, %v167_v2 }
  0xf8   :  { %v211_v27 = vmul.f32 %v196_v52, %v168_v16  ;;  %v212_v11 = vmul.f32 %v200_v53, %v169_v22  ;;  %v317_v28 = vpop.eup %316 }
  0xf9   :  { %v262_v29 = vadd.f32 %v250_v54, %v207_v24  ;;  %v263_v17 = vadd.f32 %v251_v55, %v208_v45  ;;  %v264_v30 = vadd.f32 %v252_v56, %v209_v9  ;;  %v265_v31 = vadd.f32 %v253_v57, %v210_v23 }
  0xfa   :  { %v170_v33 = vmul.f32 %v317_v28, %v158_v18  ;;  %v171_v34 = vmul.f32 %v317_v28, %v159_v0  ;;  %v172_v35 = vmul.f32 %v317_v28, %v160_v3  ;;  %v173_v36 = vmul.f32 %v317_v28, %v161_v21 }
  0xfb   :  { %v174_v37 = vmul.f32 %v317_v28, %v162_v10  ;;  %v175_v38 = vmul.f32 %v317_v28, %v163_v26  ;;  %v266_v39 = vadd.f32 %v254_v58, %v211_v27  ;;  %v267_v40 = vadd.f32 %v255_v59, %v212_v11  ;;  %274 = vst [vmem:[#allocation8] sm:$0xff] %v262_v29 }
  0xfc   :  { %275 = vst [vmem:[#allocation8 + $0x8] sm:$0xff] %v263_v17  ;;  %276 = vst [vmem:[#allocation8 + $0x10] sm:$0xff] %v264_v30  ;;  %v213_v25 = vmul.f32 %v561_v43, %v170_v33  ;;  %v214_v32 = vmul.f32 %v563_v44, %v171_v34  ;;  %v215_v50 = vmul.f32 %v565_v46, %v172_v35 }
  0xfd   :  { %277 = vst [vmem:[#allocation8 + $0x18] sm:$0xff] %v265_v31  ;;  %v216_v41 = vmul.f32 %v192_v51, %v173_v36  ;;  %v217_v42 = vmul.f32 %v196_v52, %v174_v37  ;;  %v218_v47 = vmul.f32 %v200_v53, %v175_v38  ;;  %278 = vst [vmem:[#allocation8 + $0x20] sm:$0xff] %v266_v39 }
  0xfe   :  { %279 = vst [vmem:[#allocation8 + $0x28] sm:$0xff] %v267_v40  ;;  %v268_v48 = vadd.f32 %v256_v60, %v213_v25  ;;  %v269_v49 = vadd.f32 %v257_v61, %v214_v32  ;;  %v270_v54 = vadd.f32 %v258_v62, %v215_v50 }
  0xff   :  { %v271_v55 = vadd.f32 %v259_v63, %v216_v41  ;;  %v272_v56 = vadd.f32 %v260_v4, %v217_v42  ;;  %v273_v57 = vadd.f32 %v261_v5, %v218_v47 }
 0x100   :  { %280 = vst [vmem:[#allocation8 + $0x30] sm:$0xff] %v268_v48  ;;  %281 = vst [vmem:[#allocation8 + $0x38] sm:$0xff] %v269_v49 }
 0x101   :  { %282 = vst [vmem:[#allocation8 + $0x40] sm:$0xff] %v270_v54  ;;  %283 = vst [vmem:[#allocation8 + $0x48] sm:$0xff] %v271_v55 }
 0x102   :  { %284 = vst [vmem:[#allocation8 + $0x50] sm:$0xff] %v272_v56  ;;  %285 = vst [vmem:[#allocation8 + $0x58] sm:$0xff] %v273_v57 }
 0x103   :  { %395 = shalt.err (!%p392_p0)
}
 0x104   :  { %s396_s6 = scalar_lea.hbm %s616_s4, 1536 }
 0x105   :  { %p397_p1 = scmp.ne.s32.totalorder %s616_s4, %s396_s6  ;;  %p400_p2 = scmp.lt.u32.totalorder %s396_s6, %s616_s4 }
 0x107   :  { %p402_p3 = pnand %p400_p2, %p397_p1 }
 0x109   :  { %405 = shalt.err (!%p402_p3)
}
 0x10a   :  { %297 = dma.vmem_to_hbm [thread:$0]  %s292_s26, 1536, %s616_s4, [#allocation4], %s414_s27, %s414_s27, %s415_s28  }
 0x10b   :  { %410 = dma.done.wait [#allocation4], 1536  }
 0x10c   :  { %411 = vsyncadd [#allocation4], 4294965760 }
 0x10d   :  { %301 = vsyncpa [#allocation3], 1 }
 0x10e   :  { %302 = vsyncpa [#allocation6], 1 }
 0x10f   :  { %303 = vsyncpa [#allocation4], 1 }

</bundles_post_ra>
